<compile_context>
chip_gen: v6e
topology: v6e:2x2x1
jax: 0.10.0
libtpu: 0.0.40
codegen_flags: <defaults>
</compile_context>

<pallas_src>
import functools
import math

import jax
import jax.numpy as jnp
from jax.experimental import pallas as pl
from jax.experimental.pallas import tpu as pltpu


# ---------------------------------------------------------------------------
# Fused kernel: qkv projection + per-head attention + output projection + bias
# All tensors are channel-major: rows = channels (sublanes), cols = HW (lanes).
# ---------------------------------------------------------------------------
def _fused_cross_attn_kernel(mlc_ref, mlr_ref, flr_ref,
                             wq_ref, wk_ref, wv_ref, wo_ref, bo_ref,
                             o_ref, *, num_heads, head_dim):
    x_q = mlc_ref[...]                      # (motion_dim, HW)   compute dtype
    x_k = mlr_ref[...]                      # (motion_dim, HW)
    x_v = flr_ref[...]                      # (feature_dim, HW)
    compute_dtype = x_q.dtype

    # Project all heads at once: (F, C_in) @ (C_in, HW) -> (F, HW).
    # Wq already carries the attention scale.  Cast to bf16 ONCE here.
    q_all = jnp.dot(wq_ref[...], x_q,
                    preferred_element_type=jnp.float32).astype(compute_dtype)
    k_all = jnp.dot(wk_ref[...], x_k,
                    preferred_element_type=jnp.float32).astype(compute_dtype)
    v_all = jnp.dot(wv_ref[...], x_v,
                    preferred_element_type=jnp.float32).astype(compute_dtype)

    heads_out = []
    for h in range(num_heads):
        lo = h * head_dim
        q_h = q_all[lo:lo + head_dim, :]    # (hd, HW)
        k_h = k_all[lo:lo + head_dim, :]    # (hd, HW)
        v_h = v_all[lo:lo + head_dim, :]    # (hd, HW)

        # s[q_pos, k_pos] = sum_d q_h[d, q_pos] * k_h[d, k_pos]   (no explicit
        # transposes materialized).
        s = jax.lax.dot_general(q_h, k_h, (((0,), (0,)), ((), ())),
                                preferred_element_type=jnp.float32)   # (HW, HW)
        s = s - jnp.max(s, axis=-1, keepdims=True)
        p = jnp.exp(s)
        p = p * pl.reciprocal(jnp.sum(p, axis=-1, keepdims=True), approx=True)

        # out_h[d, q_pos] = sum_k v_h[d, k] * p[q_pos, k]
        out_h = jax.lax.dot_general(v_h, p.astype(compute_dtype),
                                    (((1,), (1,)), ((), ())),
                                    preferred_element_type=jnp.float32)  # (hd, HW)
        heads_out.append(out_h)             # keep f32 (8-row tiles, aligned)

    # Single output projection: concat heads along channels (K = feature_dim
    # instead of 4 matmuls with K = head_dim) and one bf16 cast.
    out_all = jnp.concatenate(heads_out, axis=0).astype(compute_dtype)   # (F, HW)
    y = jnp.dot(wo_ref[...], out_all,
                preferred_element_type=jnp.float32)                      # (F, HW)
    o_ref[...] = (y + bo_ref[...].astype(jnp.float32)).astype(o_ref.dtype)


# ---------------------------------------------------------------------------
# Wrapper
# ---------------------------------------------------------------------------
def cross_attention_forward(ml_c, ml_r, fl_r, params, num_heads,
                            compute_dtype=jnp.bfloat16):
    """ml_c, ml_r: (B, motion_dim, H, W); fl_r: (B, feature_dim, H, W) (NCHW)."""
    B, motion_dim, H, W = ml_c.shape
    feature_dim = fl_r.shape[1]
    head_dim = feature_dim // num_heads
    HW = H * W
    scale = head_dim ** (-0.5)

    wq, wk, wv, wo, bo = (params["wq"], params["wk"], params["wv"],
                          params["wo"], params["bo"])

    # NCHW -> (B, C, HW): a plain reshape, no transpose (channel-major layout
    # is kept through the kernel, so the output reshape back is also free).
    mlc_f = ml_c.reshape(B, motion_dim, HW).astype(compute_dtype)
    mlr_f = ml_r.reshape(B, motion_dim, HW).astype(compute_dtype)
    flr_f = fl_r.reshape(B, feature_dim, HW).astype(compute_dtype)

    # Conv1x1 weights are (out_ch, in_ch); in channel-major layout the
    # projection is simply W @ x, so no weight transposes either.  Fold the
    # attention scale into Wq (zero in-kernel cost).
    wq_c = (wq * scale).astype(compute_dtype)     # (feature_dim, motion_dim)
    wk_c = wk.astype(compute_dtype)               # (feature_dim, motion_dim)
    wv_c = wv.astype(compute_dtype)               # (feature_dim, feature_dim)
    wo_c = wo.astype(compute_dtype)               # (feature_dim, feature_dim)
    bo_c = bo.reshape(feature_dim, 1).astype(jnp.float32)

    kernel = functools.partial(_fused_cross_attn_kernel,
                               num_heads=num_heads, head_dim=head_dim)

    # Advisory cost estimate for XLA's scheduler.
    flops = B * (2 * feature_dim * motion_dim * HW * 2      # q, k projections
                 + 2 * feature_dim * feature_dim * HW * 2   # v + out projections
                 + 2 * feature_dim * HW * HW * 2)           # QK^T + PV (all heads)
    transcendentals = B * num_heads * HW * (HW + 1)         # exp + reciprocal
    itemsize = jnp.dtype(compute_dtype).itemsize
    bytes_accessed = (B * HW * (2 * motion_dim + feature_dim) * itemsize
                      + (2 * feature_dim * motion_dim
                         + 2 * feature_dim * feature_dim) * itemsize
                      + feature_dim * 4
                      + B * feature_dim * HW * 4)

    out_cm = pl.pallas_call(
        kernel,
        out_shape=jax.ShapeDtypeStruct((B, feature_dim, HW), jnp.float32),
        grid_spec=pltpu.PrefetchScalarGridSpec(
            num_scalar_prefetch=0,
            grid=(B,),
            in_specs=[
                pl.BlockSpec((None, motion_dim, HW), lambda b: (b, 0, 0)),
                pl.BlockSpec((None, motion_dim, HW), lambda b: (b, 0, 0)),
                pl.BlockSpec((None, feature_dim, HW), lambda b: (b, 0, 0)),
                pl.BlockSpec((feature_dim, motion_dim), lambda b: (0, 0)),
                pl.BlockSpec((feature_dim, motion_dim), lambda b: (0, 0)),
                pl.BlockSpec((feature_dim, feature_dim), lambda b: (0, 0)),
                pl.BlockSpec((feature_dim, feature_dim), lambda b: (0, 0)),
                pl.BlockSpec((feature_dim, 1), lambda b: (0, 0)),
            ],
            out_specs=pl.BlockSpec((None, feature_dim, HW), lambda b: (b, 0, 0)),
        ),
        compiler_params=pltpu.CompilerParams(
            dimension_semantics=("parallel",)),   # batch-parallel (both v7x TCs)
        cost_estimate=pl.CostEstimate(flops=flops,
                                      transcendentals=transcendentals,
                                      bytes_accessed=bytes_accessed),
    )(mlc_f, mlr_f, flr_f, wq_c, wk_c, wv_c, wo_c, bo_c)

    # (B, F, HW) -> (B, F, H, W): free reshape, no transpose.
    return out_cm.reshape(B, feature_dim, H, W)


# ---------------------------------------------------------------------------
# Pure-JAX f32 reference (mirrors the PyTorch forward exactly).
# ---------------------------------------------------------------------------
def cross_attention_reference(ml_c, ml_r, fl_r, params, num_heads):
    B, _, H, W = ml_c.shape
    feature_dim = fl_r.shape[1]
    head_dim = feature_dim // num_heads
    scale = head_dim ** (-0.5)
    wq, wk, wv, wo, bo = (params["wq"], params["wk"], params["wv"],
                          params["wo"], params["bo"])

    def conv1x1(x, w, b=None):
        y = jnp.einsum("bchw,oc->bohw", x, w)
        if b is not None:
            y = y + b[None, :, None, None]
        return y

    q = conv1x1(ml_c, wq).reshape(B, num_heads, head_dim, H * W).transpose(0, 1, 3, 2)
    k = conv1x1(ml_r, wk).reshape(B, num_heads, head_dim, H * W).transpose(0, 1, 3, 2)
    v = conv1x1(fl_r, wv).reshape(B, num_heads, head_dim, H * W).transpose(0, 1, 3, 2)
    attn = jax.nn.softmax(jnp.einsum("bhqd,bhkd->bhqk", q, k) * scale, axis=-1)
    out = jnp.einsum("bhqk,bhkd->bhqd", attn, v)
    out = out.transpose(0, 1, 3, 2).reshape(B, feature_dim, H, W)
    return conv1x1(out, wo, bo)


if __name__ == "__main__":
    # Small, deterministic config.
    B = 2
    motion_dim = 16
    feature_dim = 32
    num_heads = 4
    H = W = 8

    key = jax.random.PRNGKey(0)
    ks = jax.random.split(key, 8)

    # Deterministic parameter init (shapes follow nn.Conv2d(..., kernel_size=1)).
    def conv_w(k, out_ch, in_ch):
        bound = 1.0 / math.sqrt(in_ch)
        return jax.random.uniform(k, (out_ch, in_ch), jnp.float32, -bound, bound)

    params = {
        "wq": conv_w(ks[0], feature_dim, motion_dim),
        "wk": conv_w(ks[1], feature_dim, motion_dim),
        "wv": conv_w(ks[2], feature_dim, feature_dim),
        "wo": conv_w(ks[3], feature_dim, feature_dim),
        "bo": jax.random.uniform(ks[4], (feature_dim,), jnp.float32,
                                 -1.0 / math.sqrt(feature_dim),
                                 1.0 / math.sqrt(feature_dim)),
    }

    ml_c = jax.random.normal(ks[5], (B, motion_dim, H, W), jnp.float32)
    ml_r = jax.random.normal(ks[6], (B, motion_dim, H, W), jnp.float32)
    fl_r = jax.random.normal(ks[7], (B, feature_dim, H, W), jnp.float32)

    out = cross_attention_forward(ml_c, ml_r, fl_r, params, num_heads)
    out = jax.block_until_ready(out)

    ref = cross_attention_reference(ml_c, ml_r, fl_r, params, num_heads)
    assert out.shape == (B, feature_dim, H, W), out.shape
    # bf16 MXU matmuls with f32 accumulation / f32 softmax vs f32 reference.
    assert jnp.allclose(out, ref, rtol=2e-2, atol=2e-2), (
        float(jnp.max(jnp.abs(out - ref))))

    print("KERNEL_OK")
</pallas_src>

<mosaic_0001>
module attributes {stable_mosaic.version = 11 : i64} {
  func.func @_fused_cross_attn_kernel(%arg0: i32, %arg1: memref<1x16x64xbf16, #tpu.memory_space<vmem>>, %arg2: memref<1x16x64xbf16, #tpu.memory_space<vmem>>, %arg3: memref<1x32x64xbf16, #tpu.memory_space<vmem>>, %arg4: memref<32x16xbf16, #tpu.memory_space<vmem>>, %arg5: memref<32x16xbf16, #tpu.memory_space<vmem>>, %arg6: memref<32x32xbf16, #tpu.memory_space<vmem>>, %arg7: memref<32x32xbf16, #tpu.memory_space<vmem>>, %arg8: memref<32x1xf32, #tpu.memory_space<vmem>>, %arg9: memref<1x32x64xf32, #tpu.memory_space<vmem>>) attributes {dimension_semantics = [#tpu.dimension_semantics<parallel>], iteration_bounds = array<i64: 2>, scalar_prefetch = 0 : i64, scratch_operands = 0 : i64, tpu.core_type = #tpu.core_type<tc>, window_params = [{transform_indices = @transform_0, window_bounds = array<i64: 1, 16, 64>}, {transform_indices = @transform_1, window_bounds = array<i64: 1, 16, 64>}, {transform_indices = @transform_2, window_bounds = array<i64: 1, 32, 64>}, {pipeline_mode = #tpu.pipeline_mode<synchronous>, transform_indices = @transform_3, window_bounds = array<i64: 32, 16>}, {pipeline_mode = #tpu.pipeline_mode<synchronous>, transform_indices = @transform_4, window_bounds = array<i64: 32, 16>}, {pipeline_mode = #tpu.pipeline_mode<synchronous>, transform_indices = @transform_5, window_bounds = array<i64: 32, 32>}, {pipeline_mode = #tpu.pipeline_mode<synchronous>, transform_indices = @transform_6, window_bounds = array<i64: 32, 32>}, {pipeline_mode = #tpu.pipeline_mode<synchronous>, transform_indices = @transform_7, window_bounds = array<i64: 32, 1>}, {transform_indices = @transform_8, window_bounds = array<i64: 1, 32, 64>}]} {
    %c0 = arith.constant 0 : index
    %c0_0 = arith.constant 0 : index
    %c0_1 = arith.constant 0 : index
    %0 = vector.load %arg1[%c0, %c0_0, %c0_1] : memref<1x16x64xbf16, #tpu.memory_space<vmem>>, vector<1x16x64xbf16>
    %1 = vector.shape_cast %0 : vector<1x16x64xbf16> to vector<16x64xbf16>
    %c0_2 = arith.constant 0 : index
    %c0_3 = arith.constant 0 : index
    %c0_4 = arith.constant 0 : index
    %2 = vector.load %arg2[%c0_2, %c0_3, %c0_4] : memref<1x16x64xbf16, #tpu.memory_space<vmem>>, vector<1x16x64xbf16>
    %3 = vector.shape_cast %2 : vector<1x16x64xbf16> to vector<16x64xbf16>
    %c0_5 = arith.constant 0 : index
    %c0_6 = arith.constant 0 : index
    %c0_7 = arith.constant 0 : index
    %4 = vector.load %arg3[%c0_5, %c0_6, %c0_7] : memref<1x32x64xbf16, #tpu.memory_space<vmem>>, vector<1x32x64xbf16>
    %5 = vector.shape_cast %4 : vector<1x32x64xbf16> to vector<32x64xbf16>
    %c0_8 = arith.constant 0 : index
    %c0_9 = arith.constant 0 : index
    %6 = vector.load %arg4[%c0_8, %c0_9] : memref<32x16xbf16, #tpu.memory_space<vmem>>, vector<32x16xbf16>
    %cst = arith.constant dense<0.000000e+00> : vector<32x64xf32>
    %7 = tpu.matmul %6, %1, %cst {dimension_numbers = #tpu.dot_dimension_numbers<[1], [0], [0], [1], [0, 0, 1, 1], [], []>} : vector<32x16xbf16>, vector<16x64xbf16>, vector<32x64xf32> -> vector<32x64xf32>
    %8 = arith.truncf %7 : vector<32x64xf32> to vector<32x64xbf16>
    %c0_10 = arith.constant 0 : index
    %c0_11 = arith.constant 0 : index
    %9 = vector.load %arg5[%c0_10, %c0_11] : memref<32x16xbf16, #tpu.memory_space<vmem>>, vector<32x16xbf16>
    %cst_12 = arith.constant dense<0.000000e+00> : vector<32x64xf32>
    %10 = tpu.matmul %9, %3, %cst_12 {dimension_numbers = #tpu.dot_dimension_numbers<[1], [0], [0], [1], [0, 0, 1, 1], [], []>} : vector<32x16xbf16>, vector<16x64xbf16>, vector<32x64xf32> -> vector<32x64xf32>
    %11 = arith.truncf %10 : vector<32x64xf32> to vector<32x64xbf16>
    %c0_13 = arith.constant 0 : index
    %c0_14 = arith.constant 0 : index
    %12 = vector.load %arg6[%c0_13, %c0_14] : memref<32x32xbf16, #tpu.memory_space<vmem>>, vector<32x32xbf16>
    %cst_15 = arith.constant dense<0.000000e+00> : vector<32x64xf32>
    %13 = tpu.matmul %12, %5, %cst_15 {dimension_numbers = #tpu.dot_dimension_numbers<[1], [0], [0], [1], [0, 0, 1, 1], [], []>} : vector<32x32xbf16>, vector<32x64xbf16>, vector<32x64xf32> -> vector<32x64xf32>
    %14 = arith.truncf %13 : vector<32x64xf32> to vector<32x64xbf16>
    %15 = vector.extract_strided_slice %8 {offsets = [0, 0], sizes = [8, 64], strides = [1, 1]} : vector<32x64xbf16> to vector<8x64xbf16>
    %16 = vector.extract_strided_slice %11 {offsets = [0, 0], sizes = [8, 64], strides = [1, 1]} : vector<32x64xbf16> to vector<8x64xbf16>
    %17 = vector.extract_strided_slice %14 {offsets = [0, 0], sizes = [8, 64], strides = [1, 1]} : vector<32x64xbf16> to vector<8x64xbf16>
    %cst_16 = arith.constant dense<0.000000e+00> : vector<64x64xf32>
    %18 = tpu.matmul %15, %16, %cst_16 {dimension_numbers = #tpu.dot_dimension_numbers<[0], [0], [1], [1], [0, 1, 1, 1], [], []>} : vector<8x64xbf16>, vector<8x64xbf16>, vector<64x64xf32> -> vector<64x64xf32>
    %cst_17 = arith.constant dense<0xFF800000> : vector<64xf32>
    %19 = vector.multi_reduction <maximumf>, %18, %cst_17 [1] : vector<64x64xf32> to vector<64xf32>
    %20 = vector.shape_cast %19 : vector<64xf32> to vector<64x1xf32>
    %21 = vector.broadcast %20 : vector<64x1xf32> to vector<64x64xf32>
    %22 = arith.subf %18, %21 : vector<64x64xf32>
    %23 = math.exp %22 : vector<64x64xf32>
    %cst_18 = arith.constant dense<0.000000e+00> : vector<64xf32>
    %24 = vector.multi_reduction <add>, %23, %cst_18 [1] : vector<64x64xf32> to vector<64xf32>
    %25 = vector.shape_cast %24 : vector<64xf32> to vector<64x1xf32>
    %26 = tpu.reciprocal %25 {approx = true} : vector<64x1xf32> -> vector<64x1xf32>
    %27 = vector.broadcast %26 : vector<64x1xf32> to vector<64x64xf32>
    %28 = arith.mulf %23, %27 : vector<64x64xf32>
    %29 = arith.truncf %28 : vector<64x64xf32> to vector<64x64xbf16>
    %cst_19 = arith.constant dense<0.000000e+00> : vector<8x64xf32>
    %30 = tpu.matmul %17, %29, %cst_19 {dimension_numbers = #tpu.dot_dimension_numbers<[1], [1], [0], [0], [0, 0, 1, 0], [], []>} : vector<8x64xbf16>, vector<64x64xbf16>, vector<8x64xf32> -> vector<8x64xf32>
    %31 = vector.extract_strided_slice %8 {offsets = [8, 0], sizes = [8, 64], strides = [1, 1]} : vector<32x64xbf16> to vector<8x64xbf16>
    %32 = vector.extract_strided_slice %11 {offsets = [8, 0], sizes = [8, 64], strides = [1, 1]} : vector<32x64xbf16> to vector<8x64xbf16>
    %33 = vector.extract_strided_slice %14 {offsets = [8, 0], sizes = [8, 64], strides = [1, 1]} : vector<32x64xbf16> to vector<8x64xbf16>
    %cst_20 = arith.constant dense<0.000000e+00> : vector<64x64xf32>
    %34 = tpu.matmul %31, %32, %cst_20 {dimension_numbers = #tpu.dot_dimension_numbers<[0], [0], [1], [1], [0, 1, 1, 1], [], []>} : vector<8x64xbf16>, vector<8x64xbf16>, vector<64x64xf32> -> vector<64x64xf32>
    %cst_21 = arith.constant dense<0xFF800000> : vector<64xf32>
    %35 = vector.multi_reduction <maximumf>, %34, %cst_21 [1] : vector<64x64xf32> to vector<64xf32>
    %36 = vector.shape_cast %35 : vector<64xf32> to vector<64x1xf32>
    %37 = vector.broadcast %36 : vector<64x1xf32> to vector<64x64xf32>
    %38 = arith.subf %34, %37 : vector<64x64xf32>
    %39 = math.exp %38 : vector<64x64xf32>
    %cst_22 = arith.constant dense<0.000000e+00> : vector<64xf32>
    %40 = vector.multi_reduction <add>, %39, %cst_22 [1] : vector<64x64xf32> to vector<64xf32>
    %41 = vector.shape_cast %40 : vector<64xf32> to vector<64x1xf32>
    %42 = tpu.reciprocal %41 {approx = true} : vector<64x1xf32> -> vector<64x1xf32>
    %43 = vector.broadcast %42 : vector<64x1xf32> to vector<64x64xf32>
    %44 = arith.mulf %39, %43 : vector<64x64xf32>
    %45 = arith.truncf %44 : vector<64x64xf32> to vector<64x64xbf16>
    %cst_23 = arith.constant dense<0.000000e+00> : vector<8x64xf32>
    %46 = tpu.matmul %33, %45, %cst_23 {dimension_numbers = #tpu.dot_dimension_numbers<[1], [1], [0], [0], [0, 0, 1, 0], [], []>} : vector<8x64xbf16>, vector<64x64xbf16>, vector<8x64xf32> -> vector<8x64xf32>
    %47 = vector.extract_strided_slice %8 {offsets = [16, 0], sizes = [8, 64], strides = [1, 1]} : vector<32x64xbf16> to vector<8x64xbf16>
    %48 = vector.extract_strided_slice %11 {offsets = [16, 0], sizes = [8, 64], strides = [1, 1]} : vector<32x64xbf16> to vector<8x64xbf16>
    %49 = vector.extract_strided_slice %14 {offsets = [16, 0], sizes = [8, 64], strides = [1, 1]} : vector<32x64xbf16> to vector<8x64xbf16>
    %cst_24 = arith.constant dense<0.000000e+00> : vector<64x64xf32>
    %50 = tpu.matmul %47, %48, %cst_24 {dimension_numbers = #tpu.dot_dimension_numbers<[0], [0], [1], [1], [0, 1, 1, 1], [], []>} : vector<8x64xbf16>, vector<8x64xbf16>, vector<64x64xf32> -> vector<64x64xf32>
    %cst_25 = arith.constant dense<0xFF800000> : vector<64xf32>
    %51 = vector.multi_reduction <maximumf>, %50, %cst_25 [1] : vector<64x64xf32> to vector<64xf32>
    %52 = vector.shape_cast %51 : vector<64xf32> to vector<64x1xf32>
    %53 = vector.broadcast %52 : vector<64x1xf32> to vector<64x64xf32>
    %54 = arith.subf %50, %53 : vector<64x64xf32>
    %55 = math.exp %54 : vector<64x64xf32>
    %cst_26 = arith.constant dense<0.000000e+00> : vector<64xf32>
    %56 = vector.multi_reduction <add>, %55, %cst_26 [1] : vector<64x64xf32> to vector<64xf32>
    %57 = vector.shape_cast %56 : vector<64xf32> to vector<64x1xf32>
    %58 = tpu.reciprocal %57 {approx = true} : vector<64x1xf32> -> vector<64x1xf32>
    %59 = vector.broadcast %58 : vector<64x1xf32> to vector<64x64xf32>
    %60 = arith.mulf %55, %59 : vector<64x64xf32>
    %61 = arith.truncf %60 : vector<64x64xf32> to vector<64x64xbf16>
    %cst_27 = arith.constant dense<0.000000e+00> : vector<8x64xf32>
    %62 = tpu.matmul %49, %61, %cst_27 {dimension_numbers = #tpu.dot_dimension_numbers<[1], [1], [0], [0], [0, 0, 1, 0], [], []>} : vector<8x64xbf16>, vector<64x64xbf16>, vector<8x64xf32> -> vector<8x64xf32>
    %63 = vector.extract_strided_slice %8 {offsets = [24, 0], sizes = [8, 64], strides = [1, 1]} : vector<32x64xbf16> to vector<8x64xbf16>
    %64 = vector.extract_strided_slice %11 {offsets = [24, 0], sizes = [8, 64], strides = [1, 1]} : vector<32x64xbf16> to vector<8x64xbf16>
    %65 = vector.extract_strided_slice %14 {offsets = [24, 0], sizes = [8, 64], strides = [1, 1]} : vector<32x64xbf16> to vector<8x64xbf16>
    %cst_28 = arith.constant dense<0.000000e+00> : vector<64x64xf32>
    %66 = tpu.matmul %63, %64, %cst_28 {dimension_numbers = #tpu.dot_dimension_numbers<[0], [0], [1], [1], [0, 1, 1, 1], [], []>} : vector<8x64xbf16>, vector<8x64xbf16>, vector<64x64xf32> -> vector<64x64xf32>
    %cst_29 = arith.constant dense<0xFF800000> : vector<64xf32>
    %67 = vector.multi_reduction <maximumf>, %66, %cst_29 [1] : vector<64x64xf32> to vector<64xf32>
    %68 = vector.shape_cast %67 : vector<64xf32> to vector<64x1xf32>
    %69 = vector.broadcast %68 : vector<64x1xf32> to vector<64x64xf32>
    %70 = arith.subf %66, %69 : vector<64x64xf32>
    %71 = math.exp %70 : vector<64x64xf32>
    %cst_30 = arith.constant dense<0.000000e+00> : vector<64xf32>
    %72 = vector.multi_reduction <add>, %71, %cst_30 [1] : vector<64x64xf32> to vector<64xf32>
    %73 = vector.shape_cast %72 : vector<64xf32> to vector<64x1xf32>
    %74 = tpu.reciprocal %73 {approx = true} : vector<64x1xf32> -> vector<64x1xf32>
    %75 = vector.broadcast %74 : vector<64x1xf32> to vector<64x64xf32>
    %76 = arith.mulf %71, %75 : vector<64x64xf32>
    %77 = arith.truncf %76 : vector<64x64xf32> to vector<64x64xbf16>
    %cst_31 = arith.constant dense<0.000000e+00> : vector<8x64xf32>
    %78 = tpu.matmul %65, %77, %cst_31 {dimension_numbers = #tpu.dot_dimension_numbers<[1], [1], [0], [0], [0, 0, 1, 0], [], []>} : vector<8x64xbf16>, vector<64x64xbf16>, vector<8x64xf32> -> vector<8x64xf32>
    %79 = tpu.concatenate %30, %46, %62, %78 in 0 : vector<8x64xf32>, vector<8x64xf32>, vector<8x64xf32>, vector<8x64xf32> -> vector<32x64xf32>
    %80 = arith.truncf %79 : vector<32x64xf32> to vector<32x64xbf16>
    %c0_32 = arith.constant 0 : index
    %c0_33 = arith.constant 0 : index
    %81 = vector.load %arg7[%c0_32, %c0_33] : memref<32x32xbf16, #tpu.memory_space<vmem>>, vector<32x32xbf16>
    %cst_34 = arith.constant dense<0.000000e+00> : vector<32x64xf32>
    %82 = tpu.matmul %81, %80, %cst_34 {dimension_numbers = #tpu.dot_dimension_numbers<[1], [0], [0], [1], [0, 0, 1, 1], [], []>} : vector<32x32xbf16>, vector<32x64xbf16>, vector<32x64xf32> -> vector<32x64xf32>
    %c0_35 = arith.constant 0 : index
    %c0_36 = arith.constant 0 : index
    %83 = vector.load %arg8[%c0_35, %c0_36] : memref<32x1xf32, #tpu.memory_space<vmem>>, vector<32x1xf32>
    %84 = vector.broadcast %83 : vector<32x1xf32> to vector<32x64xf32>
    %85 = arith.addf %82, %84 : vector<32x64xf32>
    %c0_37 = arith.constant 0 : index
    %c0_38 = arith.constant 0 : index
    %c0_39 = arith.constant 0 : index
    %86 = vector.load %arg9[%c0_37, %c0_38, %c0_39] : memref<1x32x64xf32, #tpu.memory_space<vmem>>, vector<1x32x64xf32>
    %87 = vector.shape_cast %86 : vector<1x32x64xf32> to vector<32x64xf32>
    %88 = vector.shape_cast %85 : vector<32x64xf32> to vector<1x32x64xf32>
    tpu.vector_store %arg9[%c0_37, %c0_38, %c0_39], %88 {strides = array<i32>} : memref<1x32x64xf32, #tpu.memory_space<vmem>>, vector<1x32x64xf32>,
    return
  }
  func.func @transform_0(%arg0: i32) -> (i32, i32, i32) {
    %c0_i32 = arith.constant 0 : i32
    %c0_i32_0 = arith.constant 0 : i32
    %c0_i32_1 = arith.constant 0 : i32
    return %arg0, %c0_i32, %c0_i32_0 : i32, i32, i32
  }
  func.func @transform_1(%arg0: i32) -> (i32, i32, i32) {
    %c0_i32 = arith.constant 0 : i32
    %c0_i32_0 = arith.constant 0 : i32
    %c0_i32_1 = arith.constant 0 : i32
    return %arg0, %c0_i32, %c0_i32_0 : i32, i32, i32
  }
  func.func @transform_2(%arg0: i32) -> (i32, i32, i32) {
    %c0_i32 = arith.constant 0 : i32
    %c0_i32_0 = arith.constant 0 : i32
    %c0_i32_1 = arith.constant 0 : i32
    return %arg0, %c0_i32, %c0_i32_0 : i32, i32, i32
  }
  func.func @transform_3(%arg0: i32) -> (i32, i32) {
    %c0_i32 = arith.constant 0 : i32
    %c0_i32_0 = arith.constant 0 : i32
    %c0_i32_1 = arith.constant 0 : i32
    return %c0_i32, %c0_i32_0 : i32, i32
  }
  func.func @transform_4(%arg0: i32) -> (i32, i32) {
    %c0_i32 = arith.constant 0 : i32
    %c0_i32_0 = arith.constant 0 : i32
    %c0_i32_1 = arith.constant 0 : i32
    return %c0_i32, %c0_i32_0 : i32, i32
  }
  func.func @transform_5(%arg0: i32) -> (i32, i32) {
    %c0_i32 = arith.constant 0 : i32
    %c0_i32_0 = arith.constant 0 : i32
    %c0_i32_1 = arith.constant 0 : i32
    return %c0_i32, %c0_i32_0 : i32, i32
  }
  func.func @transform_6(%arg0: i32) -> (i32, i32) {
    %c0_i32 = arith.constant 0 : i32
    %c0_i32_0 = arith.constant 0 : i32
    %c0_i32_1 = arith.constant 0 : i32
    return %c0_i32, %c0_i32_0 : i32, i32
  }
  func.func @transform_7(%arg0: i32) -> (i32, i32) {
    %c0_i32 = arith.constant 0 : i32
    %c0_i32_0 = arith.constant 0 : i32
    %c0_i32_1 = arith.constant 0 : i32
    return %c0_i32, %c0_i32_0 : i32, i32
  }
  func.func @transform_8(%arg0: i32) -> (i32, i32, i32) {
    %c0_i32 = arith.constant 0 : i32
    %c0_i32_0 = arith.constant 0 : i32
    %c0_i32_1 = arith.constant 0 : i32
    return %arg0, %c0_i32, %c0_i32_0 : i32, i32, i32
  }
}

</mosaic_0001>

<bundles_post_ra>
// kernel: tpu_custom_call.1
= control target key start
LH: loop header
LB: loop body
LE: loop exit
PB: predicated region body
PF: predicated region fallthrough
CT: control target
= control target key end

     0   :  { %13 = vsyncpa [#allocation3], 0  ;;  %s2916_s0 = inlined_call_operand.vmem [shape: bf16[2,16,64], index: 0, kind: input, shape index: {}]   ;;  %s2917_s1 = inlined_call_operand.vmem [shape: bf16[2,16,64], index: 1, kind: input, shape index: {}]   ;;  %s2918_s2 = inlined_call_operand.vmem [shape: bf16[2,32,64], index: 2, kind: input, shape index: {}]   ;;  %s2919_s3 = inlined_call_operand.vmem [shape: bf16[32,16], index: 3, kind: input, shape index: {}]   ;;  %s2920_s4 = inlined_call_operand.vmem [shape: bf16[32,16], index: 4, kind: input, shape index: {}]   ;;  %s2921_s5 = inlined_call_operand.vmem [shape: bf16[32,32], index: 5, kind: input, shape index: {}]   ;;  %s2922_s6 = inlined_call_operand.hbm [shape: bf16[32,32], index: 6, kind: input, shape index: {}]   ;;  %s2923_s7 = inlined_call_operand.vmem [shape: f32[32,1], index: 7, kind: input, shape index: {}]   ;;  %s2924_s8 = inlined_call_operand.hbm [shape: f32[2,32,64], index: 8, kind: output, shape index: {}]  }
   0x1   :  { %14 = vsyncpa [#allocation4], 0 }
   0x2   :  { %16 = vsyncpa [#allocation4 + $0x1], 0  ;;  %s2388_s27 = smov 0   ;;  %s2390_s28 = smov 0  }
   0x3   :  { %s2392_s29 = smov 0   ;;  %s2394_s30 = smov 0  }
   0x4 LB: > { %s2409_s9 = sadd.s32 4294967295, %s2332_s30   ;;  %s1807_s10 = sadd.s32 4294967294, %s2332_s30   ;;  %s2332_s30 = sphi %s2394_s30, %s2932_s30   ;;  %s2328_s29 = sphi %s2392_s29, %s2931_s29   ;;  %s2324_s28 = sphi %s2390_s28, %s2930_s28   ;;  %s2320_s27 = sphi %s2388_s27, %s2929_s27  }
   0x5   : > { %s2413_s11 = sadd.s32 1, %s2332_s30   ;;  %s212_s12 = sadd.s32 1, %s2328_s29 }
   0x6   : > { %s209_s13 = ssub.s32 %s2332_s30, %s2413_s11  ;;  %p222_p0 = scmp.ne.s32.totalorder %s2328_s29, %s2324_s28 }
   0x7   : > { %p210_p1 = scmp.eq.s32.totalorder %s209_s13, 0  ;;  %p223_p2 = scmp.eq.s32.totalorder %s2409_s9, 1 }
   0x8   : > { %p228_p3 = scmp.ne.s32.totalorder %s2324_s28, %s2320_s27  ;;  %p229_p4 = scmp.eq.s32.totalorder %s1807_s10, 1 }
   0x9   : > { %s2424_s14 = scalar_select %p210_p1, %s2328_s29, %s212_s12  }
   0xa   : > { %p2426_p5 = por %p223_p2, %p222_p0  ;;  %p2430_p6 = por %p229_p4, %p228_p3 }
   0xb   : > { %p1808_p7 = scmp.ge.s32.totalorder %s2332_s30, 1  ;;  %p236_p8 = scmp.lt.s32.totalorder %s2332_s30, 3 }
   0xc   : > { %s2926_s16 = scalar_select %p2430_p6, 1, 0 }
   0xd   : > { %p2057_p9 = scmp.eq.s32.totalorder %s2409_s9, 0  ;;  %p2437_p10 = pnand %p1808_p7, %p236_p8 }
   0xe   : > { %s2334_s18 = smov [#allocation2]  }
   0xf   : > { %s257_s19 = sshll.u32 %s2334_s18, 4  ;;  %p2049_p11 = pneg %p2437_p10  ;;  %s258_s19 = int_to_ptr.vmem [resolvable:$true] %s257_s19 }
  0x10   : > { %s2253_s20 = scalar_lea.vmem %s258_s19, 256  ;;  %p2261_p3 = scmp.lt.s32.totalorder %s258_s19, %s258_s19 }
  0x11   : > { %p2050_p12 = pnand %p2057_p9, %p2049_p11  ;;  %p2254_p0 = scmp.ne.s32.totalorder %s258_s19, %s2253_s20 }
  0x12   : > { %p2262_p4 = scmp.lt.s32.totalorder %s2253_s20, %s2253_s20 }
  0x13   : > { %p2244_p13 = pneg %p2050_p12 }
  0x14   : > { %p2263_p6 = por %p2262_p4, %p2261_p3 }
  0x15   : > { %p2256_p1 = pnand %p2254_p0, %p2244_p13 }
  0x17   : > { %p2257_p2 = pneg %p2256_p1 }
  0x19   : > { %p2264_p7 = pnand %p2263_p6, %p2257_p2 }
  0x1b   : > { %2267 = shalt.err (!%p2264_p7)
}
  0x1c   : > { %s2335_s21 = smov 64   ;;  %s2336_s22 = smov 4  }
  0x1d   : > { %2052 = dma.hbm_to_vmem [thread:$0]  (!%p2050_p12), %s2922_s6, 256, %s258_s19, [#allocation3], %s2335_s21, %s2335_s21, %s2336_s22  }
  0x1e   : > { %300 = sbr.rel (%p2437_p10) target bundleno = 1900 (0x76c), region = 52 }
  0x23   : > { %2311 = dma.done.wait (%p2057_p9), [#allocation3], 256  }
  0x24   : > { %2313 = vsyncadd (%p2057_p9), [#allocation3], 4294967040  ;;  %p344_p8 = scmp.lt.s32.totalorder %s2409_s9, 1  ;;  %vm388_vm0 = vcmask 130048   ;;  %v2103_v1 = vld [vmem:[%s2919_s3] sm:$0xff]   ;;  %v2104_v2 = vld [vmem:[%s2919_s3 + $0x8] sm:$0xff]  }
  0x25   : > { %1925 = vmatprep.mubr.msk.bf16.mxu0 %vm388_vm0, %v2103_v1  ;;  %v2106_v4 = vld [vmem:[%s2920_s4] sm:$0xff]   ;;  %v2107_v5 = vld [vmem:[%s2920_s4 + $0x8] sm:$0xff]   ;;  %vm636_vm1 = vcmask 1043456   ;;  %vm623_vm2 = vcmask 64512   ;;  %vm705_vm3 = vcmask 523264   ;;  %vm549_vm4 = vcmask 261120  }
  0x26   : > { %s345_s25 = scalar_select %p344_p8, %s2409_s9, 1  ;;  %1931 = vmatprep.mubr.msk.bf16.mxu1 %vm388_vm0, %v2106_v4  ;;  %v2110_v59 = vld [vmem:[%s2921_s5] sm:$0xff]   ;;  %v2111_v60 = vld [vmem:[%s2921_s5 + $0x8] sm:$0xff]   ;;  %vm2338_vm5 = vmmov 0  }
  0x27   : > { %s341_s17 = sand.u32 1, %s2324_s28  }
  0x28   : > { %s1865_s26 = sshll.u32 %s345_s25, 3  ;;  %s1867_s22 = sshll.u32 %s345_s25, 4 }
  0x29   : > { %s348_s13 = scalar_lea.vmem %s2916_s0, %s1865_s26  ;;  %s353_s19 = scalar_lea.vmem %s2917_s1, %s1865_s26 }
  0x2a   : > { %v2102_v0 = vld [vmem:[%s348_s13] sm:$0xff]   ;;  %s2475_s18 = scalar_lea.vmem %s2918_s2, %s1867_s22  ;;  %s1868_s22 = sshll.u32 %s2409_s9, 9 }
  0x2b   : > { %1923 = vmatprep.subr.bf16.mxu0 %v2102_v0  ;;  %v2105_v3 = vld [vmem:[%s353_s19] sm:$0xff]   ;;  %v2108_v54 = vld [vmem:[%s2475_s18 + $0x8] sm:$0xff]   ;;  %s1813_s19 = sshll.u32 %s341_s17, 5  ;;  %s2872_s10 = scalar_lea.hbm %s2924_s8, %s1868_s22 }
  0x2c   : > { %1924 = vmatpush3.bf16.msra.mxu0 %v2102_v0  ;;  %1929 = vmatprep.subr.bf16.mxu1 %v2105_v3  ;;  %v2109_v56 = vld [vmem:[%s2475_s18] sm:$0xff]   ;;  %s343_s20 = scalar_lea.vmem [#allocation5], %s1813_s19  ;;  %s2876_s9 = scalar_lea.sflag [#allocation4], %s341_s17 }
  0x2d   : > { %1930 = vmatpush3.bf16.msra.mxu1 %v2105_v3  ;;  %1935 = vmatprep.subr.bf16.mxu0 %v2108_v54  ;;  %s1709_s21 = sshll.u32 %s343_s20, 4  ;;  %s2340_s13 = smov [#allocation5]   ;;  %s2867_s21 = int_to_ptr.vmem [resolvable:$true] %s1709_s21 }
  0x2e   : > { %s2268_s12 = scalar_lea.vmem %s2867_s21, 512  ;;  %s2272_s26 = sshll.u32 %s2340_s13, 4  ;;  %s2273_s26 = int_to_ptr.vmem [resolvable:$false] %s2272_s26 }
  0x2f   : > { %1926 = vmatmul.mubr.msk.bf16.vlgmr.msra.gmra.mxu0 %vm388_vm0, %v2104_v2  ;;  %p2269_p6 = scmp.ne.s32.totalorder %s2867_s21, %s2268_s12  ;;  %s2274_s18 = scalar_lea.vmem %s2273_s26, 1024 }
  0x30   : > { %1932 = vmatmul.mubr.msk.bf16.vlgmr.msra.gmra.mxu1 %vm388_vm0, %v2107_v5  ;;  %1936 = vmatpush3.bf16.msra.mxu0 %v2108_v54  ;;  %p2275_p11 = scmp.lt.s32.totalorder %s2867_s21, %s2273_s26  ;;  %p2276_p12 = scmp.lt.s32.totalorder %s2274_s18, %s2268_s12 }
  0x31   : > { %1937 = vmatprep.subr.bf16.mxu0 %v2109_v56  ;;  %1939 = vmatprep.mubr.msk.bf16.mxu0 %vm549_vm4, %v2110_v59  ;;  %p2270_p9 = pnand %p2269_p6, %p2426_p5 }
  0x32   : > { %p2277_p13 = por %p2276_p12, %p2275_p11 }
  0x33   : > { %p2271_p10 = pneg %p2270_p9 }
  0x34   : > { %1938 = vmatpush3.bf16.msra.mxu0 %v2109_v56 }
  0x35   : > { %p2278_p0 = pnand %p2277_p13, %p2271_p10 }
  0x37   : > { %1940 = vmatmul.mubr.msk.bf16.vlgmr.msra.gmra.mxu0 %vm549_vm4, %v2111_v60 }
  0xef   : > { %v1927_v6 = vpop.f32.mrf.mxu0 }
  0xf0   : > { %v1933_v8 = vpop.f32.mrf.mxu1 }
  0xf1   : > { %v429_v7 = vpop.f32.mrf.mxu0 }
  0xf2   : > { %v506_v11 = vpop.f32.mrf.mxu1 }
  0xf3   : > { %v1928_v9 = vpop.f32.mrf.mxu0 }
  0xf4   : > { %v2483_v10 = vpack.c.bf16 %v1928_v9, %v1927_v6  ;;  %v1934_v14 = vpop.f32.mrf.mxu1 }
  0xf5   : > { %v432_v12 = vpop.f32.mrf.mxu0  ;;  %v2485_v15 = vpack.c.bf16 %v1934_v14, %v1933_v8 }
  0xf6   : > { %v444_v13 = vpack.c.bf16 %v432_v12, %v429_v7  ;;  %v509_v16 = vpop.f32.mrf.mxu1 }
  0xf7   : > { %v521_v17 = vpack.c.bf16 %v509_v16, %v506_v11 }
  0xf8   : > { %607 = vxpose.xlu0.c.b16.start.end [1/1] (short) (narrow) %v444_v13, 64  ;;  %v854_v20 = vrot.slane %v444_v13, 4 }
  0xf9   : > { %v873_v18 = vrot.slane %v521_v17, 4  ;;  %2039 = vmatprep.subr.msk.bf16.mxu1 %vm636_vm1, %v521_v17  ;;  %v638_v19 = vsel %vm636_vm1, %v521_v17, 0 }
  0xfa   : > { %1944 = vmatpush3.bf16.msra.mxu1 %v638_v19 }
  0xfb   : > { %2040 = vmatprep.subr.msk.bf16.mxu1 %vm636_vm1, %v873_v18  ;;  %v887_v23 = vsel %vm636_vm1, %v873_v18, 0 }
 0x105   : > { %856 = vxpose.xlu0.c.b16.start.end [1/1] (short) (narrow) %v854_v20, 64 }
 0x15a   : > { %v615_v21 = vpop.trf.xlu0 }
 0x15b   : > { %1945 = vmatprep.mubr.msk.bf16.mxu1 %vm623_vm2, %v615_v21 }
 0x15e   : > { %v616_v22 = vpop.trf.xlu0 }
 0x15f   : > { %1946 = vmatmul.mubr.msk.bf16.vlgmr.msra.gmra.mxu1 %vm623_vm2, %v616_v22 }
 0x160   : > { %1966 = vmatpush3.bf16.msra.mxu1 %v887_v23 }
 0x162   : > { %v617_v24 = vpop.trf.xlu0 }
 0x163   : > { %1949 = vmatprep.mubr.msk.bf16.mxu1 %vm623_vm2, %v617_v24 }
 0x166   : > { %v618_v25 = vpop.trf.xlu0 }
 0x167   : > { %1950 = vmatmul.mubr.msk.bf16.gmra.mxu1 %vm623_vm2, %v618_v25 }
 0x16a   : > { %v864_v26 = vpop.trf.xlu0 }
 0x16b   : > { %1967 = vmatprep.mubr.msk.bf16.mxu1 %vm623_vm2, %v864_v26 }
 0x16e   : > { %v865_v27 = vpop.trf.xlu0 }
 0x16f   : > { %1968 = vmatmul.mubr.msk.bf16.vlgmr.msra.gmra.mxu1 %vm623_vm2, %v865_v27 }
 0x172   : > { %v866_v28 = vpop.trf.xlu0 }
 0x173   : > { %1971 = vmatprep.mubr.msk.bf16.mxu1 %vm623_vm2, %v866_v28 }
 0x176   : > { %v867_v29 = vpop.trf.xlu0 }
 0x177   : > { %1972 = vmatmul.mubr.msk.bf16.gmra.mxu1 %vm623_vm2, %v867_v29 }
 0x21f   : > { %v2499_v30 = vpop.f32.mrf.mxu1 }
 0x220   : > { %v712_v46 = vsel %vm705_vm3, %v2499_v30, -inf }
 0x221   : > { %v2501_v31 = vpop.f32.mrf.mxu1 }
 0x222   : > { %v706_v44 = vsel %vm705_vm3, %v2501_v31, -inf }
 0x223   : > { %v2503_v32 = vpop.f32.mrf.mxu1 }
 0x224   : > { %v715_v57 = vsel %vm705_vm3, %v2503_v32, -inf }
 0x225   : > { %v2505_v33 = vpop.f32.mrf.mxu1 }
 0x226   : > { %v709_v0 = vsel %vm705_vm3, %v2505_v33, -inf }
 0x227   : > { %v1951_v34 = vpop.f32.mrf.mxu1 }
 0x228   : > { %v724_v35 = vsel %vm705_vm3, %v1951_v34, -inf }
 0x229   : > { %725 = vmax.xlane.f32.xlu1 %v724_v35  ;;  %v2508_v36 = vpop.f32.mrf.mxu1 }
 0x22a   : > { %v718_v38 = vsel %vm705_vm3, %v2508_v36, -inf }
 0x22b   : > { %v1952_v37 = vpop.f32.mrf.mxu1 }
 0x22c   : > { %v727_v42 = vsel %vm705_vm3, %v1952_v37, -inf }
 0x22d   : > { %719 = vmax.xlane.f32.xlu1 %v718_v38  ;;  %v2512_v39 = vpop.f32.mrf.mxu1 }
 0x22e   : > { %v721_v40 = vsel %vm705_vm3, %v2512_v39, -inf }
 0x22f   : > { %722 = vmax.xlane.f32.xlu0 %v721_v40  ;;  %v2516_v41 = vpop.f32.mrf.mxu1 }
 0x230   : > { %v960_v62 = vsel %vm705_vm3, %v2516_v41, -inf }
 0x231   : > { %728 = vmax.xlane.f32.xlu1 %v727_v42  ;;  %v2519_v43 = vpop.f32.mrf.mxu1 }
 0x232   : > { %v954_v48 = vsel %vm705_vm3, %v2519_v43, -inf }
 0x233   : > { %707 = vmax.xlane.f32.xlu0 %v706_v44  ;;  %v2523_v45 = vpop.f32.mrf.mxu1 }
 0x234   : > { %v963_v63 = vsel %vm705_vm3, %v2523_v45, -inf }
 0x235   : > { %713 = vmax.xlane.f32.xlu1 %v712_v46  ;;  %v2527_v47 = vpop.f32.mrf.mxu1 }
 0x236   : > { %v957_v1 = vsel %vm705_vm3, %v2527_v47, -inf }
 0x237   : > { %955 = vmax.xlane.f32.xlu0 %v954_v48  ;;  %v1973_v49 = vpop.f32.mrf.mxu1 }
 0x238   : > { %v972_v50 = vsel %vm705_vm3, %v1973_v49, -inf }
 0x239   : > { %973 = vmax.xlane.f32.xlu1 %v972_v50  ;;  %v939_v51 = vpop.f32.mrf.mxu1 }
 0x23a   : > { %v966_v52 = vsel %vm705_vm3, %v939_v51, -inf }
 0x23b   : > { %v1974_v53 = vpop.f32.mrf.mxu1 }
 0x23c   : > { %v975_v55 = vsel %vm705_vm3, %v1974_v53, -inf }
 0x23d   : > { %967 = vmax.xlane.f32.xlu1 %v966_v52  ;;  %v2538_v58 = vpop.f32.mrf.mxu1 }
 0x23e   : > { %v969_v61 = vsel %vm705_vm3, %v2538_v58, -inf }
 0x241   : > { %976 = vmax.xlane.f32.xlu1 %v975_v55 }
 0x245   : > { %716 = vmax.xlane.f32.xlu1 %v715_v57 }
 0x249   : > { %970 = vmax.xlane.f32.xlu1 %v969_v61 }
 0x24d   : > { %961 = vmax.xlane.f32.xlu1 %v960_v62 }
 0x251   : > { %964 = vmax.xlane.f32.xlu1 %v963_v63 }
 0x255   : > { %710 = vmax.xlane.f32.xlu1 %v709_v0 }
 0x259   : > { %958 = vmax.xlane.f32.xlu1 %v957_v1 }
 0x2b2   : > { %v726_v2 = vpop.xlane.xlu1 %725 }
 0x2b3   : > { %v736_v3 = vsub.f32 %v1951_v34, %v726_v2 }
 0x2b5   : > { %v750_v4 = vmul.f32 1.442695, %v736_v3 }
 0x2b6   : > { %v720_v5 = vpop.xlane.xlu1 %719 }
 0x2b7   : > { %2114 = vpow2.f32 %v750_v4  ;;  %v734_v11 = vsub.f32 %v2508_v36, %v720_v5 }
 0x2b8   : > { %v723_v17 = vpop.xlane.xlu0 %722 }
 0x2b9   : > { %v746_v16 = vmul.f32 1.442695, %v734_v11  ;;  %v735_v22 = vsub.f32 %v2512_v39, %v723_v17 }
 0x2ba   : > { %v729_v6 = vpop.xlane.xlu1 %728 }
 0x2bb   : > { %v737_v7 = vsub.f32 %v1952_v37, %v729_v6  ;;  %v748_v28 = vmul.f32 1.442695, %v735_v22 }
 0x2bc   : > { %v708_v37 = vpop.xlane.xlu0 %707 }
 0x2bd   : > { %v752_v8 = vmul.f32 1.442695, %v737_v7  ;;  %v730_v42 = vsub.f32 %v2501_v31, %v708_v37 }
 0x2be   : > { %v714_v9 = vpop.xlane.xlu1 %713 }
 0x2bf   : > { %2116 = vpow2.f32 %v752_v8  ;;  %v732_v23 = vsub.f32 %v2499_v30, %v714_v9  ;;  %v738_v52 = vmul.f32 1.442695, %v730_v42 }
 0x2c0   : > { %v956_v50 = vpop.xlane.xlu0 %955 }
 0x2c1   : > { %v742_v29 = vmul.f32 1.442695, %v732_v23 }
 0x2c2   : > { %v974_v12 = vpop.xlane.xlu1 %973 }
 0x2c3   : > { %v984_v13 = vsub.f32 %v1973_v49, %v974_v12  ;;  %v2337_v12 = vmov 0.0  }
 0x2c4   : > { %v2559_v14 = vpop.eup %2114  ;;  %1953 = vmatprep.subr.bf16.mxu0 %v2337_v12  ;;  %1975 = vmatprep.subr.bf16.mxu1 %v2337_v12 }
 0x2c5   : > { %v998_v18 = vmul.f32 1.442695, %v984_v13  ;;  %v772_v19 = vsel %vm705_vm3, %v2559_v14, 0.0  ;;  %1961 = vmatprep.mubr.msk.bf16.mxu0 %vm2338_vm5, %v2337_v12  ;;  %1983 = vmatprep.mubr.msk.bf16.mxu1 %vm2338_vm5, %v2337_v12 }
 0x2c6   : > { %773 = vadd.xlane.f32.xlu0 %v772_v19  ;;  %v968_v20 = vpop.xlane.xlu1 %967 }
 0x2c7   : > { %2118 = vpow2.f32 %v998_v18  ;;  %v982_v21 = vsub.f32 %v939_v51, %v968_v20 }
 0x2c8   : > { %2120 = vpow2.f32 %v746_v16 }
 0x2c9   : > { %v994_v24 = vmul.f32 1.442695, %v982_v21 }
 0x2ca   : > { %v977_v25 = vpop.xlane.xlu1 %976 }
 0x2cb   : > { %v985_v26 = vsub.f32 %v1974_v53, %v977_v25  ;;  %2122 = vpow2.f32 %v994_v24  ;;  %v978_v53 = vsub.f32 %v2519_v43, %v956_v50  ;;  %v1941_v24 = vpop.f32.mrf.mxu0 }
 0x2cc   : > { %v2565_v27 = vpop.eup %2116 }
 0x2cd   : > { %v1000_v34 = vmul.f32 1.442695, %v985_v26  ;;  %v775_v35 = vsel %vm705_vm3, %v2565_v27, 0.0  ;;  %v2635_v25 = vpop.f32.mrf.mxu0 }
 0x2ce   : > { %v717_v36 = vpop.xlane.xlu1 %716  ;;  %776 = vadd.xlane.f32.xlu1 %v775_v35 }
 0x2cf   : > { %2124 = vpow2.f32 %v1000_v34  ;;  %v733_v30 = vsub.f32 %v2503_v32, %v717_v36  ;;  %v1942_v26 = vpop.f32.mrf.mxu0 }
 0x2d0   : > { %2126 = vpow2.f32 %v748_v28  ;;  %v2637_v28 = vpack.c.bf16 %v1942_v26, %v1941_v24 }
 0x2d1   : > { %2128 = vpow2.f32 %v742_v29  ;;  %v744_v44 = vmul.f32 1.442695, %v733_v30  ;;  %v1347_v29 = vrot.slane %v2483_v10, 4 }
 0x2d2   : > { %v971_v38 = vpop.xlane.xlu1 %970 }
 0x2d3   : > { %v983_v39 = vsub.f32 %v2538_v58, %v971_v38 }
 0x2d4   : > { %v2571_v40 = vpop.eup %2118 }
 0x2d5   : > { %v996_v46 = vmul.f32 1.442695, %v983_v39  ;;  %v1020_v48 = vsel %vm705_vm3, %v2571_v40, 0.0  ;;  %v2576_v49 = vpop.eup %2120 }
 0x2d6   : > { %1021 = vadd.xlane.f32.xlu0 %v1020_v48  ;;  %v962_v51 = vpop.xlane.xlu1 %961  ;;  %v766_v31 = vsel %vm705_vm3, %v2576_v49, 0.0 }
 0x2d7   : > { %2130 = vpow2.f32 %v996_v46  ;;  %v980_v32 = vsub.f32 %v2516_v41, %v962_v51  ;;  %v986_v41 = vmul.f32 1.442695, %v978_v53 }
 0x2d8   : > { %2132 = vpow2.f32 %v744_v44  ;;  %v2582_v55 = vpop.eup %2122 }
 0x2d9   : > { %v990_v54 = vmul.f32 1.442695, %v980_v32  ;;  %v1014_v43 = vsel %vm705_vm3, %v2582_v55, 0.0 }
 0x2da   : > { %767 = vadd.xlane.f32.xlu0 %v766_v31  ;;  %v965_v56 = vpop.xlane.xlu1 %964 }
 0x2db   : > { %2134 = vpow2.f32 %v990_v54  ;;  %v981_v57 = vsub.f32 %v2523_v45, %v965_v56 }
 0x2dc   : > { %v2585_v58 = vpop.eup %2124  ;;  %2136 = vpow2.f32 %v738_v52 }
 0x2dd   : > { %v2587_v59 = vpop.eup %2126  ;;  %v992_v60 = vmul.f32 1.442695, %v981_v57  ;;  %v1023_v61 = vsel %vm705_vm3, %v2585_v58, 0.0 }
 0x2de   : > { %v2593_v62 = vpop.eup %2128  ;;  %1015 = vadd.xlane.f32.xlu0 %v1014_v43  ;;  %1024 = vadd.xlane.f32.xlu1 %v1023_v61  ;;  %v711_v63 = vpop.xlane.xlu1 %710  ;;  %v769_v2 = vsel %vm705_vm3, %v2587_v59, 0.0 }
 0x2df   : > { %2138 = vpow2.f32 %v992_v60  ;;  %v731_v45 = vsub.f32 %v2505_v33, %v711_v63  ;;  %v760_v1 = vsel %vm705_vm3, %v2593_v62, 0.0 }
 0x2e0   : > { %2140 = vpow2.f32 %v986_v41 }
 0x2e1   : > { %v740_v0 = vmul.f32 1.442695, %v731_v45 }
 0x2e2   : > { %761 = vadd.xlane.f32.xlu0 %v760_v1  ;;  %v959_v3 = vpop.xlane.xlu1 %958  ;;  %770 = vadd.xlane.f32.xlu1 %v769_v2 }
 0x2e3   : > { %2142 = vpow2.f32 %v740_v0  ;;  %v979_v4 = vsub.f32 %v2527_v47, %v959_v3 }
 0x2e4   : > { %v2601_v5 = vpop.eup %2130 }
 0x2e5   : > { %v988_v6 = vmul.f32 1.442695, %v979_v4  ;;  %v1017_v33 = vsel %vm705_vm3, %v2601_v5, 0.0  ;;  %v2605_v7 = vpop.eup %2132 }
 0x2e6   : > { %1018 = vadd.xlane.f32.xlu1 %v1017_v33  ;;  %v763_v47 = vsel %vm705_vm3, %v2605_v7, 0.0 }
 0x2e7   : > { %2144 = vpow2.f32 %v988_v6 }
 0x2e8   : > { %v2607_v8 = vpop.eup %2134 }
 0x2e9   : > { %v2609_v9 = vpop.eup %2136  ;;  %v1008_v11 = vsel %vm705_vm3, %v2607_v8, 0.0 }
 0x2ea   : > { %1009 = vadd.xlane.f32.xlu0 %v1008_v11  ;;  %764 = vadd.xlane.f32.xlu1 %v763_v47  ;;  %v754_v17 = vsel %vm705_vm3, %v2609_v9, 0.0 }
 0x2ec   : > { %v2617_v13 = vpop.eup %2138 }
 0x2ed   : > { %v1011_v16 = vsel %vm705_vm3, %v2617_v13, 0.0  ;;  %v2623_v18 = vpop.eup %2140 }
 0x2ee   : > { %1012 = vadd.xlane.f32.xlu1 %v1011_v16  ;;  %755 = vadd.xlane.f32.xlu0 %v754_v17  ;;  %v1002_v21 = vsel %vm705_vm3, %v2623_v18, 0.0 }
 0x2f0   : > { %v2625_v19 = vpop.eup %2142 }
 0x2f1   : > { %v757_v20 = vsel %vm705_vm3, %v2625_v19, 0.0 }
 0x2f2   : > { %758 = vadd.xlane.f32.xlu1 %v757_v20  ;;  %1003 = vadd.xlane.f32.xlu0 %v1002_v21 }
 0x2f4   : > { %v2631_v22 = vpop.eup %2144 }
 0x2f5   : > { %v1005_v23 = vsel %vm705_vm3, %v2631_v22, 0.0 }
 0x2f6   : > { %1006 = vadd.xlane.f32.xlu1 %v1005_v23 }
 0x31f   : > { %1103 = vxpose.xlu0.c.b16.start.end [1/1] (short) (narrow) %v2483_v10, 64 }
 0x323   : > { %1349 = vxpose.xlu1.c.b16.start.end [1/1] (short) (narrow) %v1347_v29, 64 }
 0x34f   : > { %v774_v34 = vpop.xlane.xlu0 %773 }
 0x350   : > { %2146 = vrcp.f32 %v774_v34 }
 0x357   : > { %v777_v35 = vpop.xlane.xlu1 %776 }
 0x358   : > { %2148 = vrcp.f32 %v777_v35 }
 0x35d   : > { %v2147_v37 = vpop.eup %2146 }
 0x35e   : > { %v792_v39 = vmul.f32 %v2147_v37, %v2559_v14 }
 0x35f   : > { %v1022_v36 = vpop.xlane.xlu0 %1021 }
 0x360   : > { %2150 = vrcp.f32 %v1022_v36 }
 0x363   : > { %v768_v30 = vpop.xlane.xlu0 %767 }
 0x365   : > { %v2149_v38 = vpop.eup %2148 }
 0x366   : > { %v793_v42 = vmul.f32 %v2149_v38, %v2565_v27 }
 0x367   : > { %v1025_v44 = vpop.xlane.xlu1 %1024  ;;  %v1016_v48 = vpop.xlane.xlu0 %1015 }
 0x368   : > { %2152 = vrcp.f32 %v1025_v44  ;;  %v797_v46 = vpack.c.bf16 %v793_v42, %v792_v39  ;;  %v593_v42 = vpop.f32.mrf.mxu0 }
 0x369   : > { %2154 = vrcp.f32 %v768_v30 }
 0x36a   : > { %v811_v10 = vsel %vm705_vm3, %v797_v46, 0  ;;  %v605_v46 = vpack.c.bf16 %v593_v42, %v2635_v25 }
 0x36b   : > { %v771_v50 = vpop.xlane.xlu1 %770  ;;  %1954 = vmatpush3.bf16.xpose.msra.mxu0 %v811_v10  ;;  %v762_v51 = vpop.xlane.xlu0 %761 }
 0x36c   : > { %2156 = vrcp.f32 %v771_v50  ;;  %1955 = vmatprep.subr.bf16.mxu0 %v2337_v12  ;;  %v1047_v10 = vrot.slane %v605_v46, 4 }
 0x36d   : > { %2158 = vrcp.f32 %v1016_v48  ;;  %v2151_v14 = vpop.eup %2150 }
 0x36e   : > { %v1040_v54 = vmul.f32 %v2151_v14, %v2571_v40 }
 0x36f   : > { %v1019_v32 = vpop.xlane.xlu1 %1018 }
 0x370   : > { %2160 = vrcp.f32 %v1019_v32 }
 0x371   : > { %2162 = vrcp.f32 %v762_v51 }
 0x373   : > { %v765_v52 = vpop.xlane.xlu1 %764  ;;  %v1010_v27 = vpop.xlane.xlu0 %1009 }
 0x374   : > { %2164 = vrcp.f32 %v765_v52 }
 0x375   : > { %v2153_v53 = vpop.eup %2152  ;;  %2166 = vrcp.f32 %v1010_v27 }
 0x376   : > { %v1041_v31 = vmul.f32 %v2153_v53, %v2585_v58  ;;  %v2155_v56 = vpop.eup %2154 }
 0x377   : > { %v1013_v57 = vpop.xlane.xlu1 %1012  ;;  %v756_v41 = vpop.xlane.xlu0 %755  ;;  %v790_v63 = vmul.f32 %v2155_v56, %v2576_v49 }
 0x378   : > { %2168 = vrcp.f32 %v1013_v57  ;;  %v1045_v60 = vpack.c.bf16 %v1041_v31, %v1040_v54 }
 0x379   : > { %v2157_v43 = vpop.eup %2156  ;;  %2170 = vrcp.f32 %v756_v41 }
 0x37a   : > { %v1061_v61 = vsel %vm705_vm3, %v1045_v60, 0  ;;  %v791_v45 = vmul.f32 %v2157_v43, %v2587_v59  ;;  %v2159_v0 = vpop.eup %2158 }
 0x37b   : > { %v759_v1 = vpop.xlane.xlu1 %758  ;;  %1976 = vmatpush3.bf16.xpose.msra.mxu1 %v1061_v61  ;;  %v1004_v2 = vpop.xlane.xlu0 %1003  ;;  %v1038_v4 = vmul.f32 %v2159_v0, %v2582_v55 }
 0x37c   : > { %2172 = vrcp.f32 %v759_v1  ;;  %v796_v40 = vpack.c.bf16 %v791_v45, %v790_v63  ;;  %1977 = vmatprep.subr.bf16.mxu1 %v2337_v12 }
 0x37d   : > { %v2161_v58 = vpop.eup %2160  ;;  %2174 = vrcp.f32 %v1004_v2 }
 0x37e   : > { %v808_v3 = vsel %vm705_vm3, %v796_v40, 0  ;;  %v1039_v6 = vmul.f32 %v2161_v58, %v2601_v5  ;;  %v2163_v33 = vpop.eup %2162 }
 0x37f   : > { %v1007_v49 = vpop.xlane.xlu1 %1006  ;;  %1956 = vmatpush3.bf16.xpose.msra.mxu0 %v808_v3  ;;  %v788_v16 = vmul.f32 %v2163_v33, %v2593_v62 }
 0x380   : > { %2176 = vrcp.f32 %v1007_v49  ;;  %v1044_v59 = vpack.c.bf16 %v1039_v6, %v1038_v4  ;;  %1957 = vmatprep.subr.bf16.mxu0 %v2337_v12 }
 0x381   : > { %v2165_v11 = vpop.eup %2164 }
 0x382   : > { %v1058_v47 = vsel %vm705_vm3, %v1044_v59, 0  ;;  %v789_v17 = vmul.f32 %v2165_v11, %v2605_v7  ;;  %v2167_v20 = vpop.eup %2166 }
 0x383   : > { %1978 = vmatpush3.bf16.xpose.msra.mxu1 %v1058_v47  ;;  %v1036_v23 = vmul.f32 %v2167_v20, %v2607_v8 }
 0x384   : > { %v795_v21 = vpack.c.bf16 %v789_v17, %v788_v16  ;;  %1979 = vmatprep.subr.bf16.mxu1 %v2337_v12 }
 0x385   : > { %v2169_v55 = vpop.eup %2168  ;;  %v1357_v48 = vpop.trf.xlu1 }
 0x386   : > { %v805_v5 = vsel %vm705_vm3, %v795_v21, 0  ;;  %v1037_v24 = vmul.f32 %v2169_v55, %v2617_v13  ;;  %v2171_v26 = vpop.eup %2170 }
 0x387   : > { %1958 = vmatpush3.bf16.xpose.msra.mxu0 %v805_v5  ;;  %v786_v34 = vmul.f32 %v2171_v26, %v2609_v9  ;;  %v1111_v9 = vpop.trf.xlu0 }
 0x388   : > { %v1043_v29 = vpack.c.bf16 %v1037_v24, %v1036_v23  ;;  %1959 = vmatprep.subr.bf16.mxu0 %v2337_v12 }
 0x389   : > { %v2173_v62 = vpop.eup %2172  ;;  %v1358_v25 = vpop.trf.xlu1 }
 0x38a   : > { %v1055_v7 = vsel %vm705_vm3, %v1043_v29, 0  ;;  %v787_v35 = vmul.f32 %v2173_v62, %v2625_v19  ;;  %v2175_v36 = vpop.eup %2174  ;;  %v1366_v19 = vrot.slane %v2485_v15, 4 }
 0x38b   : > { %1980 = vmatpush3.bf16.xpose.msra.mxu1 %v1055_v7  ;;  %v1034_v30 = vmul.f32 %v2175_v36, %v2623_v18  ;;  %v1132_v18 = vsel %vm636_vm1, %v2485_v15, 0 }
 0x38c   : > { %v794_v37 = vpack.c.bf16 %v787_v35, %v786_v34  ;;  %1981 = vmatprep.subr.bf16.mxu1 %v2337_v12  ;;  %v1380_v50 = vsel %vm636_vm1, %v1366_v19, 0 }
 0x38d   : > { %v2177_v8 = vpop.eup %2176 }
 0x38e   : > { %v802_v13 = vsel %vm705_vm3, %v794_v37, 0  ;;  %v1035_v38 = vmul.f32 %v2177_v8, %v2631_v22  ;;  %v1112_v22 = vpop.trf.xlu0 }
 0x38f   : > { %1960 = vmatpush3.bf16.xpose.msra.mxu0 %v802_v13 }
 0x390   : > { %2041 = vmatprep.subr.msk.bf16.mxu0 %vm636_vm1, %v2485_v15  ;;  %v1042_v39 = vpack.c.bf16 %v1035_v38, %v1034_v30  ;;  %v1359_v15 = vpop.trf.xlu1 }
 0x392   : > { %v1052_v44 = vsel %vm705_vm3, %v1042_v39, 0  ;;  %v1113_v51 = vpop.trf.xlu0 }
 0x393   : > { %1982 = vmatpush3.bf16.xpose.msra.mxu1 %v1052_v44 }
 0x394   : > { %2042 = vmatprep.subr.msk.bf16.mxu1 %vm636_vm1, %v1366_v19  ;;  %v1360_v14 = vpop.trf.xlu1 }
 0x396   : > { %1962 = vmatmul.mubr.msk.bf16.vlgmr.msra.gmra.mxu0 %vm705_vm3, %v605_v46  ;;  %v1114_v32 = vpop.trf.xlu0 }
 0x397   : > { %1988 = vmatpush3.bf16.msra.mxu0 %v1132_v18  ;;  %1989 = vmatprep.mubr.msk.bf16.mxu0 %vm623_vm2, %v1111_v9 }
 0x398   : > { %1997 = vmatprep.subr.bf16.mxu0 %v2337_v12 }
 0x39a   : > { %1984 = vmatmul.mubr.msk.bf16.vlgmr.msra.gmra.mxu1 %vm705_vm3, %v1047_v10 }
 0x39b   : > { %2010 = vmatpush3.bf16.msra.mxu1 %v1380_v50  ;;  %2011 = vmatprep.mubr.msk.bf16.mxu1 %vm623_vm2, %v1357_v48 }
 0x39c   : > { %2019 = vmatprep.subr.bf16.mxu1 %v2337_v12 }
 0x39e   : > { %1990 = vmatmul.mubr.msk.bf16.vlgmr.msra.gmra.mxu0 %vm623_vm2, %v1112_v22 }
 0x39f   : > { %1993 = vmatprep.mubr.msk.bf16.mxu0 %vm623_vm2, %v1113_v51 }
 0x3a2   : > { %2012 = vmatmul.mubr.msk.bf16.vlgmr.msra.gmra.mxu1 %vm623_vm2, %v1358_v25 }
 0x3a3   : > { %2015 = vmatprep.mubr.msk.bf16.mxu1 %vm623_vm2, %v1359_v15 }
 0x3a6   : > { %1994 = vmatmul.mubr.msk.bf16.gmra.mxu0 %vm623_vm2, %v1114_v32 }
 0x3a7   : > { %2005 = vmatprep.mubr.msk.bf16.mxu0 %vm2338_vm5, %v2337_v12 }
 0x3aa   : > { %2016 = vmatmul.mubr.msk.bf16.gmra.mxu1 %vm623_vm2, %v1360_v14 }
 0x3ab   : > { %2027 = vmatprep.mubr.msk.bf16.mxu1 %vm2338_vm5, %v2337_v12 }
 0x456   : > { %v847_v52 = vpop.f32.mrf.mxu0 }
 0x458   : > { %v1963_v27 = vpop.f32.mrf.mxu0 }
 0x45a   : > { %v850_v53 = vpop.f32.mrf.mxu0  ;;  %v1097_v54 = vpop.f32.mrf.mxu1 }
 0x45b   : > { %v2699_v31 = vpack.c.bf16 %v1097_v54, %v847_v52 }
 0x45c   : > { %v1964_v56 = vpop.f32.mrf.mxu0  ;;  %v1985_v57 = vpop.f32.mrf.mxu1 }
 0x45e   : > { %v1100_v41 = vpop.f32.mrf.mxu1  ;;  %v2701_v60 = vpop.f32.mrf.mxu0 }
 0x45f   : > { %v1205_v23 = vsel %vm705_vm3, %v2701_v60, -inf }
 0x460   : > { %v1986_v43 = vpop.f32.mrf.mxu1  ;;  %v2703_v61 = vpop.f32.mrf.mxu0 }
 0x461   : > { %v1199_v62 = vsel %vm705_vm3, %v2703_v61, -inf }
 0x462   : > { %v2705_v63 = vpop.f32.mrf.mxu0  ;;  %v2707_v45 = vpop.f32.mrf.mxu1 }
 0x463   : > { %v1453_v26 = vsel %vm705_vm3, %v2707_v45, -inf  ;;  %v1208_v29 = vsel %vm705_vm3, %v2705_v63, -inf }
 0x464   : > { %v2709_v0 = vpop.f32.mrf.mxu0  ;;  %v2711_v1 = vpop.f32.mrf.mxu1 }
 0x465   : > { %v1447_v34 = vsel %vm705_vm3, %v2711_v1, -inf  ;;  %v1202_v35 = vsel %vm705_vm3, %v2709_v0, -inf }
 0x466   : > { %v1995_v2 = vpop.f32.mrf.mxu0  ;;  %v2713_v40 = vpop.f32.mrf.mxu1 }
 0x467   : > { %v1217_v58 = vsel %vm705_vm3, %v1995_v2, -inf  ;;  %v1456_v7 = vsel %vm705_vm3, %v2713_v40, -inf }
 0x468   : > { %v2716_v3 = vpop.f32.mrf.mxu1  ;;  %1218 = vmax.xlane.f32.xlu0 %v1217_v58  ;;  %v1184_v4 = vpop.f32.mrf.mxu0 }
 0x469   : > { %v1211_v16 = vsel %vm705_vm3, %v1184_v4, -inf  ;;  %v1450_v36 = vsel %vm705_vm3, %v2716_v3, -inf }
 0x46a   : > { %v1996_v6 = vpop.f32.mrf.mxu0  ;;  %v2017_v33 = vpop.f32.mrf.mxu1 }
 0x46b   : > { %v1465_v49 = vsel %vm705_vm3, %v2017_v33, -inf  ;;  %v1220_v59 = vsel %vm705_vm3, %v1996_v6, -inf }
 0x46c   : > { %v1432_v11 = vpop.f32.mrf.mxu1  ;;  %1466 = vmax.xlane.f32.xlu0 %v1465_v49  ;;  %1221 = vmax.xlane.f32.xlu1 %v1220_v59  ;;  %v1187_v20 = vpop.f32.mrf.mxu0 }
 0x46d   : > { %v1459_v21 = vsel %vm705_vm3, %v1432_v11, -inf  ;;  %v1214_v55 = vsel %vm705_vm3, %v1187_v20, -inf }
 0x46e   : > { %v2018_v47 = vpop.f32.mrf.mxu1 }
 0x46f   : > { %v1468_v17 = vsel %vm705_vm3, %v2018_v47, -inf }
 0x470   : > { %1212 = vmax.xlane.f32.xlu0 %v1211_v16  ;;  %1469 = vmax.xlane.f32.xlu1 %v1468_v17  ;;  %v1435_v5 = vpop.f32.mrf.mxu1 }
 0x471   : > { %v1462_v24 = vsel %vm705_vm3, %v1435_v5, -inf }
 0x474   : > { %1460 = vmax.xlane.f32.xlu0 %v1459_v21  ;;  %1215 = vmax.xlane.f32.xlu1 %v1214_v55 }
 0x478   : > { %1206 = vmax.xlane.f32.xlu0 %v1205_v23  ;;  %1463 = vmax.xlane.f32.xlu1 %v1462_v24 }
 0x47c   : > { %1454 = vmax.xlane.f32.xlu0 %v1453_v26  ;;  %1209 = vmax.xlane.f32.xlu1 %v1208_v29 }
 0x480   : > { %1200 = vmax.xlane.f32.xlu0 %v1199_v62  ;;  %1457 = vmax.xlane.f32.xlu1 %v1456_v7 }
 0x484   : > { %1448 = vmax.xlane.f32.xlu0 %v1447_v34  ;;  %1203 = vmax.xlane.f32.xlu1 %v1202_v35 }
 0x488   : > { %1451 = vmax.xlane.f32.xlu1 %v1450_v36 }
 0x4f1   : > { %v1219_v37 = vpop.xlane.xlu0 %1218 }
 0x4f2   : > { %v1229_v8 = vsub.f32 %v1995_v2, %v1219_v37 }
 0x4f4   : > { %v1243_v13 = vmul.f32 1.442695, %v1229_v8 }
 0x4f5   : > { %v1467_v30 = vpop.xlane.xlu0 %1466  ;;  %v1222_v38 = vpop.xlane.xlu1 %1221 }
 0x4f6   : > { %2178 = vpow2.f32 %v1243_v13  ;;  %v1477_v39 = vsub.f32 %v2017_v33, %v1467_v30  ;;  %v1230_v9 = vsub.f32 %v1996_v6, %v1222_v38 }
 0x4f8   : > { %v1491_v42 = vmul.f32 1.442695, %v1477_v39  ;;  %v1245_v19 = vmul.f32 1.442695, %v1230_v9 }
 0x4f9   : > { %v1213_v44 = vpop.xlane.xlu0 %1212  ;;  %v1470_v46 = vpop.xlane.xlu1 %1469 }
 0x4fa   : > { %2180 = vpow2.f32 %v1491_v42  ;;  %v1227_v48 = vsub.f32 %v1184_v4, %v1213_v44  ;;  %v1478_v18 = vsub.f32 %v2018_v47, %v1470_v46 }
 0x4fb   : > { %2182 = vpow2.f32 %v1245_v19 }
 0x4fc   : > { %v1239_v22 = vmul.f32 1.442695, %v1227_v48  ;;  %v1493_v10 = vmul.f32 1.442695, %v1478_v18 }
 0x4fd   : > { %v1461_v50 = vpop.xlane.xlu0 %1460  ;;  %v1216_v25 = vpop.xlane.xlu1 %1215 }
 0x4fe   : > { %2184 = vpow2.f32 %v1239_v22  ;;  %v1475_v51 = vsub.f32 %v1432_v11, %v1461_v50  ;;  %v1228_v15 = vsub.f32 %v1187_v20, %v1216_v25 }
 0x4ff   : > { %2186 = vpow2.f32 %v1493_v10 }
 0x500   : > { %v1487_v32 = vmul.f32 1.442695, %v1475_v51  ;;  %v1241_v14 = vmul.f32 1.442695, %v1228_v15 }
 0x501   : > { %v1207_v52 = vpop.xlane.xlu0 %1206  ;;  %v1464_v27 = vpop.xlane.xlu1 %1463 }
 0x502   : > { %2188 = vpow2.f32 %v1487_v32  ;;  %v1225_v53 = vsub.f32 %v2701_v60, %v1207_v52  ;;  %v1476_v54 = vsub.f32 %v1435_v5, %v1464_v27 }
 0x503   : > { %v2742_v56 = vpop.eup %2178  ;;  %2190 = vpow2.f32 %v1241_v14 }
 0x504   : > { %v1235_v57 = vmul.f32 1.442695, %v1225_v53  ;;  %v1489_v41 = vmul.f32 1.442695, %v1476_v54  ;;  %v1265_v43 = vsel %vm705_vm3, %v2742_v56, 0.0 }
 0x505   : > { %1266 = vadd.xlane.f32.xlu0 %v1265_v43  ;;  %v1455_v2 = vpop.xlane.xlu0 %1454  ;;  %v1210_v58 = vpop.xlane.xlu1 %1209 }
 0x506   : > { %2192 = vpow2.f32 %v1235_v57  ;;  %v1473_v4 = vsub.f32 %v2707_v45, %v1455_v2  ;;  %v1226_v6 = vsub.f32 %v2705_v63, %v1210_v58 }
 0x507   : > { %v2748_v33 = vpop.eup %2180  ;;  %2194 = vpow2.f32 %v1489_v41 }
 0x508   : > { %v2750_v60 = vpop.eup %2182  ;;  %v1483_v49 = vmul.f32 1.442695, %v1473_v4  ;;  %v1237_v59 = vmul.f32 1.442695, %v1226_v6  ;;  %v1513_v11 = vsel %vm705_vm3, %v2748_v33, 0.0 }
 0x509   : > { %1514 = vadd.xlane.f32.xlu0 %v1513_v11  ;;  %v1201_v47 = vpop.xlane.xlu0 %1200  ;;  %v1268_v16 = vsel %vm705_vm3, %v2750_v60, 0.0  ;;  %v1458_v17 = vpop.xlane.xlu1 %1457 }
 0x50a   : > { %2196 = vpow2.f32 %v1483_v49  ;;  %v1223_v45 = vsub.f32 %v2703_v61, %v1201_v47  ;;  %1269 = vadd.xlane.f32.xlu1 %v1268_v16  ;;  %v1474_v63 = vsub.f32 %v2713_v40, %v1458_v17 }
 0x50b   : > { %v2758_v20 = vpop.eup %2184  ;;  %2198 = vpow2.f32 %v1237_v59 }
 0x50c   : > { %v2760_v21 = vpop.eup %2186  ;;  %v1231_v55 = vmul.f32 1.442695, %v1223_v45  ;;  %v1485_v5 = vmul.f32 1.442695, %v1474_v63  ;;  %v1259_v23 = vsel %vm705_vm3, %v2758_v20, 0.0 }
 0x50d   : > { %1260 = vadd.xlane.f32.xlu0 %v1259_v23  ;;  %v1449_v24 = vpop.xlane.xlu0 %1448  ;;  %v1516_v26 = vsel %vm705_vm3, %v2760_v21, 0.0  ;;  %v1204_v29 = vpop.xlane.xlu1 %1203 }
 0x50e   : > { %2200 = vpow2.f32 %v1231_v55  ;;  %v1471_v61 = vsub.f32 %v2711_v1, %v1449_v24  ;;  %1517 = vadd.xlane.f32.xlu1 %v1516_v26  ;;  %v1224_v40 = vsub.f32 %v2709_v0, %v1204_v29 }
 0x50f   : > { %v2768_v62 = vpop.eup %2188  ;;  %2202 = vpow2.f32 %v1485_v5 }
 0x510   : > { %v2770_v7 = vpop.eup %2190  ;;  %v1479_v34 = vmul.f32 1.442695, %v1471_v61  ;;  %v1233_v35 = vmul.f32 1.442695, %v1224_v40  ;;  %v1507_v36 = vsel %vm705_vm3, %v2768_v62, 0.0 }
 0x511   : > { %1508 = vadd.xlane.f32.xlu0 %v1507_v36  ;;  %v1262_v37 = vsel %vm705_vm3, %v2770_v7, 0.0  ;;  %v1452_v8 = vpop.xlane.xlu1 %1451 }
 0x512   : > { %2204 = vpow2.f32 %v1479_v34  ;;  %1263 = vadd.xlane.f32.xlu1 %v1262_v37  ;;  %v1472_v1 = vsub.f32 %v2716_v3, %v1452_v8 }
 0x513   : > { %v2777_v0 = vpop.eup %2192  ;;  %2206 = vpow2.f32 %v1233_v35 }
 0x514   : > { %v2779_v13 = vpop.eup %2194  ;;  %v1481_v30 = vmul.f32 1.442695, %v1472_v1  ;;  %v1253_v38 = vsel %vm705_vm3, %v2777_v0, 0.0 }
 0x515   : > { %1254 = vadd.xlane.f32.xlu0 %v1253_v38  ;;  %v1510_v39 = vsel %vm705_vm3, %v2779_v13, 0.0 }
 0x516   : > { %2208 = vpow2.f32 %v1481_v30  ;;  %1511 = vadd.xlane.f32.xlu1 %v1510_v39 }
 0x517   : > { %v2785_v9 = vpop.eup %2196 }
 0x518   : > { %v2787_v42 = vpop.eup %2198  ;;  %v1501_v3 = vsel %vm705_vm3, %v2785_v9, 0.0 }
 0x519   : > { %1502 = vadd.xlane.f32.xlu0 %v1501_v3  ;;  %v1256_v19 = vsel %vm705_vm3, %v2787_v42, 0.0 }
 0x51a   : > { %1257 = vadd.xlane.f32.xlu1 %v1256_v19 }
 0x51b   : > { %v2793_v44 = vpop.eup %2200 }
 0x51c   : > { %v2795_v46 = vpop.eup %2202  ;;  %v1247_v48 = vsel %vm705_vm3, %v2793_v44, 0.0 }
 0x51d   : > { %1248 = vadd.xlane.f32.xlu0 %v1247_v48  ;;  %v1504_v18 = vsel %vm705_vm3, %v2795_v46, 0.0 }
 0x51e   : > { %1505 = vadd.xlane.f32.xlu1 %v1504_v18 }
 0x51f   : > { %v2801_v22 = vpop.eup %2204 }
 0x520   : > { %v2803_v10 = vpop.eup %2206  ;;  %v1495_v50 = vsel %vm705_vm3, %v2801_v22, 0.0 }
 0x521   : > { %1496 = vadd.xlane.f32.xlu0 %v1495_v50  ;;  %v1250_v25 = vsel %vm705_vm3, %v2803_v10, 0.0 }
 0x522   : > { %1251 = vadd.xlane.f32.xlu1 %v1250_v25 }
 0x523   : > { %v2809_v51 = vpop.eup %2208 }
 0x524   : > { %v1498_v15 = vsel %vm705_vm3, %v2809_v51, 0.0 }
 0x526   : > { %1499 = vadd.xlane.f32.xlu1 %v1498_v15 }
 0x58e   : > { %v1267_v32 = vpop.xlane.xlu0 %1266 }
 0x58f   : > { %2210 = vrcp.f32 %v1267_v32 }
 0x592   : > { %v1515_v14 = vpop.xlane.xlu0 %1514 }
 0x593   : > { %v1270_v52 = vpop.xlane.xlu1 %1269 }
 0x594   : > { %2212 = vrcp.f32 %v1270_v52 }
 0x595   : > { %2214 = vrcp.f32 %v1515_v14 }
 0x596   : > { %v1261_v27 = vpop.xlane.xlu0 %1260 }
 0x597   : > { %v1518_v53 = vpop.xlane.xlu1 %1517 }
 0x598   : > { %2216 = vrcp.f32 %v1518_v53 }
 0x599   : > { %2218 = vrcp.f32 %v1261_v27 }
 0x59a   : > { %v1509_v54 = vpop.xlane.xlu0 %1508 }
 0x59b   : > { %v1264_v57 = vpop.xlane.xlu1 %1263 }
 0x59c   : > { %2220 = vrcp.f32 %v1264_v57  ;;  %v2211_v43 = vpop.eup %2210 }
 0x59d   : > { %2222 = vrcp.f32 %v1509_v54  ;;  %v1285_v6 = vmul.f32 %v2211_v43, %v2742_v56 }
 0x59e   : > { %v1255_v41 = vpop.xlane.xlu0 %1254 }
 0x59f   : > { %v1512_v2 = vpop.xlane.xlu1 %1511 }
 0x5a0   : > { %2224 = vrcp.f32 %v1512_v2 }
 0x5a1   : > { %v2213_v58 = vpop.eup %2212  ;;  %2226 = vrcp.f32 %v1255_v41  ;;  %v1605_v41 = vld [vmem:[%s2923_s7 + $0x18] sm:$0xff] }
 0x5a2   : > { %v1503_v4 = vpop.xlane.xlu0 %1502  ;;  %v1286_v49 = vmul.f32 %v2213_v58, %v2750_v60  ;;  %v2215_v59 = vpop.eup %2214 }
 0x5a3   : > { %v1258_v11 = vpop.xlane.xlu1 %1257  ;;  %v1533_v63 = vmul.f32 %v2215_v59, %v2748_v33 }
 0x5a4   : > { %2228 = vrcp.f32 %v1258_v11  ;;  %v1290_v47 = vpack.c.bf16 %v1286_v49, %v1285_v6 }
 0x5a5   : > { %v2217_v16 = vpop.eup %2216  ;;  %2230 = vrcp.f32 %v1503_v4 }
 0x5a6   : > { %v1249_v17 = vpop.xlane.xlu0 %1248  ;;  %v1304_v45 = vsel %vm705_vm3, %v1290_v47, 0  ;;  %v1534_v55 = vmul.f32 %v2217_v16, %v2760_v21  ;;  %v2219_v5 = vpop.eup %2218  ;;  %v2113_v16 = vld [vmem:[#allocation2 + $0x8] sm:$0xff]  }
 0x5a7   : > { %1998 = vmatpush3.bf16.xpose.msra.mxu0 %v1304_v45  ;;  %v1506_v23 = vpop.xlane.xlu1 %1505  ;;  %v1283_v26 = vmul.f32 %v2219_v5, %v2758_v20 }
 0x5a8   : > { %2232 = vrcp.f32 %v1506_v23  ;;  %v1538_v56 = vpack.c.bf16 %v1534_v55, %v1533_v63  ;;  %1999 = vmatprep.subr.bf16.mxu0 %v2337_v12 }
 0x5a9   : > { %v2221_v60 = vpop.eup %2220  ;;  %2234 = vrcp.f32 %v1249_v17 }
 0x5aa   : > { %v1554_v24 = vsel %vm705_vm3, %v1538_v56, 0  ;;  %v1284_v29 = vmul.f32 %v2221_v60, %v2770_v7  ;;  %v2223_v61 = vpop.eup %2222  ;;  %v1497_v40 = vpop.xlane.xlu0 %1496 }
 0x5ab   : > { %2020 = vmatpush3.bf16.xpose.msra.mxu1 %v1554_v24  ;;  %v1252_v33 = vpop.xlane.xlu1 %1251  ;;  %v1531_v36 = vmul.f32 %v2223_v61, %v2768_v62 }
 0x5ac   : > { %2236 = vrcp.f32 %v1252_v33  ;;  %v1289_v21 = vpack.c.bf16 %v1284_v29, %v1283_v26  ;;  %2021 = vmatprep.subr.bf16.mxu1 %v2337_v12 }
 0x5ad   : > { %v2225_v34 = vpop.eup %2224  ;;  %2238 = vrcp.f32 %v1497_v40 }
 0x5ae   : > { %v1301_v35 = vsel %vm705_vm3, %v1289_v21, 0  ;;  %v1532_v37 = vmul.f32 %v2225_v34, %v2779_v13  ;;  %v2227_v8 = vpop.eup %2226 }
 0x5af   : > { %2000 = vmatpush3.bf16.xpose.msra.mxu0 %v1301_v35  ;;  %v1500_v20 = vpop.xlane.xlu1 %1499  ;;  %v1281_v38 = vmul.f32 %v2227_v8, %v2777_v0 }
 0x5b0   : > { %2240 = vrcp.f32 %v1500_v20  ;;  %v1537_v7 = vpack.c.bf16 %v1532_v37, %v1531_v36  ;;  %2001 = vmatprep.subr.bf16.mxu0 %v2337_v12 }
 0x5b1   : > { %v2229_v1 = vpop.eup %2228 }
 0x5b2   : > { %v1551_v30 = vsel %vm705_vm3, %v1537_v7, 0  ;;  %v1282_v39 = vmul.f32 %v2229_v1, %v2787_v42  ;;  %v2231_v3 = vpop.eup %2230 }
 0x5b3   : > { %2022 = vmatpush3.bf16.xpose.msra.mxu1 %v1551_v30  ;;  %v1529_v48 = vmul.f32 %v2231_v3, %v2785_v9 }
 0x5b4   : > { %v1288_v19 = vpack.c.bf16 %v1282_v39, %v1281_v38  ;;  %2023 = vmatprep.subr.bf16.mxu1 %v2337_v12 }
 0x5b5   : > { %v2233_v62 = vpop.eup %2232 }
 0x5b6   : > { %v1298_v13 = vsel %vm705_vm3, %v1288_v19, 0  ;;  %v1530_v18 = vmul.f32 %v2233_v62, %v2795_v46  ;;  %v2235_v50 = vpop.eup %2234 }
 0x5b7   : > { %2002 = vmatpush3.bf16.xpose.msra.mxu0 %v1298_v13  ;;  %v1279_v15 = vmul.f32 %v2235_v50, %v2793_v44  ;;  %v1540_v44 = vrot.slane %v2637_v28, 4 }
 0x5b8   : > { %v1536_v25 = vpack.c.bf16 %v1530_v18, %v1529_v48  ;;  %2003 = vmatprep.subr.bf16.mxu0 %v2337_v12 }
 0x5b9   : > { %v2237_v0 = vpop.eup %2236 }
 0x5ba   : > { %v1548_v42 = vsel %vm705_vm3, %v1536_v25, 0  ;;  %v1280_v32 = vmul.f32 %v2237_v0, %v2803_v10  ;;  %v2239_v14 = vpop.eup %2238  ;;  %v2339_v10 = vmov 0  }
 0x5bb   : > { %2024 = vmatpush3.bf16.xpose.msra.mxu1 %v1548_v42  ;;  %v1527_v27 = vmul.f32 %v2239_v14, %v2801_v22  ;;  %v1603_v22 = vld [vmem:[%s2923_s7 + $0x8] sm:$0xff]  ;;  %2101 = vset.pattern.permute.xlu1 %v2339_v10 }
 0x5bc   : > { %v1287_v52 = vpack.c.bf16 %v1280_v32, %v1279_v15  ;;  %2025 = vmatprep.subr.bf16.mxu1 %v2337_v12  ;;  %v2112_v12 = vld [vmem:[#allocation2] sm:$0xff]   ;;  %2100 = vset.pattern.permute.xlu0 %v2339_v10 }
 0x5bd   : > { %v2241_v9 = vpop.eup %2240  ;;  %1613 = vperm.xlu1 %2101, %v1603_v22  }
 0x5be   : > { %v1295_v46 = vsel %vm705_vm3, %v1287_v52, 0  ;;  %v1528_v53 = vmul.f32 %v2241_v9, %v2809_v51  ;;  %v1602_v51 = vld [vmem:[%s2923_s7] sm:$0xff] }
 0x5bf   : > { %2004 = vmatpush3.bf16.xpose.msra.mxu0 %v1295_v46  ;;  %1608 = vperm.xlu0 %2100, %v1602_v51  }
 0x5c0   : > { %v1535_v54 = vpack.c.bf16 %v1528_v53, %v1527_v27 }
 0x5c2   : > { %v1545_v57 = vsel %vm705_vm3, %v1535_v54, 0 }
 0x5c3   : > { %2026 = vmatpush3.bf16.xpose.msra.mxu1 %v1545_v57 }
 0x5c6   : > { %2006 = vmatmul.mubr.msk.bf16.vlgmr.msra.gmra.mxu0 %vm705_vm3, %v2637_v28  ;;  %v1604_v28 = vld [vmem:[%s2923_s7 + $0x10] sm:$0xff] }
 0x5c7   : > { %2035 = vmatprep.mubr.msk.bf16.mxu0 %vm549_vm4, %v2112_v12  ;;  %1618 = vperm.xlu1 %2101, %v1604_v28  }
 0x5ca   : > { %2028 = vmatmul.mubr.msk.bf16.vlgmr.msra.gmra.mxu1 %vm705_vm3, %v1540_v44 }
 0x5cb   : > { %1623 = vperm.xlu1 %2101, %v1605_v41  }
 0x638   : > { %v1614_v17 = vpop.permute.xlu1 %1613 }
 0x63a   : > { %v1609_v55 = vpop.permute.xlu0 %1608 }
 0x642   : > { %v1619_v45 = vpop.permute.xlu1 %1618 }
 0x646   : > { %v1624_v60 = vpop.permute.xlu1 %1623 }
 0x686   : > { %v1340_v43 = vpop.f32.mrf.mxu0 }
 0x688   : > { %v2007_v2 = vpop.f32.mrf.mxu0 }
 0x68a   : > { %v1343_v58 = vpop.f32.mrf.mxu0  ;;  %v1590_v4 = vpop.f32.mrf.mxu1 }
 0x68b   : > { %v1597_v6 = vpack.c.bf16 %v1590_v4, %v1340_v43 }
 0x68c   : > { %v2008_v49 = vpop.f32.mrf.mxu0  ;;  %v2029_v59 = vpop.f32.mrf.mxu1 }
 0x68d   : > { %2031 = vmatprep.subr.bf16.mxu0 %v1597_v6 }
 0x68e   : > { %v1593_v11 = vpop.f32.mrf.mxu1  ;;  %2032 = vmatpush3.bf16.msra.mxu0 %v1597_v6 }
 0x68f   : > { %2033 = vmatprep.subr.bf16.mxu0 %v2699_v31 }
 0x690   : > { %v2030_v47 = vpop.f32.mrf.mxu1 }
 0x692   : > { %2034 = vmatpush3.bf16.msra.mxu0 %v2699_v31 }
 0x695   : > { %2036 = vmatmul.mubr.msk.bf16.vlgmr.msra.gmra.mxu0 %vm549_vm4, %v2113_v16 }
 0x755   : > { %v2037_v63 = vpop.f32.mrf.mxu0 }
 0x756   : > { %v1685_v5 = vadd.f32 %v2037_v63, %v1619_v45 }
 0x757   : > { %v1676_v23 = vpop.f32.mrf.mxu0 }
 0x758   : > { %1693 = vst.msk [vmem:[%s343_s20 + $0x10] sm:$0xff] %vm705_vm3, %v1685_v5  ;;  %v1677_v56 = vadd.f32 %v1676_v23, %v1609_v55 }
 0x759   : > { %v2038_v24 = vpop.f32.mrf.mxu0 }
 0x75a   : > { %1691 = vst.msk [vmem:[%s343_s20] sm:$0xff] %vm705_vm3, %v1677_v56  ;;  %v1688_v31 = vadd.f32 %v2038_v24, %v1624_v60 }
 0x75b   : > { %v1679_v26 = vpop.f32.mrf.mxu0 }
 0x75c   : > { %1694 = vst.msk [vmem:[%s343_s20 + $0x18] sm:$0xff] %vm705_vm3, %v1688_v31  ;;  %v1680_v29 = vadd.f32 %v1679_v26, %v1614_v17 }
 0x75e   : > { %1692 = vst.msk [vmem:[%s343_s20 + $0x8] sm:$0xff] %vm705_vm3, %v1680_v29 }
 0x75f   : > { %2281 = shalt.err (!%p2278_p0)
}
 0x760   : > { %s2282_s25 = scalar_lea.hbm %s2872_s10, 512  ;;  %s2286_s20 = scalar_lea.hbm %s2924_s8, 1024 }
 0x761   : > { %p2283_p1 = scmp.ne.s32.totalorder %s2872_s10, %s2282_s25  ;;  %p2287_p4 = scmp.lt.s32.totalorder %s2872_s10, %s2924_s8 }
 0x762   : > { %p2288_p7 = scmp.lt.s32.totalorder %s2286_s20, %s2282_s25 }
 0x763   : > { %p2284_p2 = pnand %p2283_p1, %p2426_p5 }
 0x764   : > { %p2289_p8 = por %p2288_p7, %p2287_p4 }
 0x765   : > { %p2285_p3 = pneg %p2284_p2 }
 0x767   : > { %p2290_p6 = pnand %p2289_p8, %p2285_p3 }
 0x769   : > { %2293 = shalt.err (!%p2290_p6)
}
 0x76a   : > { %s2341_s24 = smov 128   ;;  %s2342_s12 = smov 8  }
 0x76b   : > { %2047 = dma.vmem_to_hbm [thread:$0]  (%p2426_p5), %s2867_s21, 512, %s2872_s10, %s2876_s9, %s2341_s24, %s2341_s24, %s2342_s12  }
 0x76c PF: > { %p2059_p9 = scmp.ge.s32.totalorder %s2332_s30, 2  ;;  %s1724_s13 = sand.u32 1, %s2320_s27  }
 0x76d   : > { %p2928_p10 = scmp.ne.s32.totalorder %s2926_s16, 0  ;;  %s1725_s26 = scalar_lea.sflag [#allocation4], %s1724_s13 }
 0x76f   : > { %p2054_p11 = pnand %p2059_p9, %p2928_p10 }
 0x771   : > { %p2055_p12 = pneg %p2054_p11 }
 0x773   : > { %2315 = dma.done.wait (%p2055_p12), %s1725_s26, 512  }
 0x774   : > { %2317 = vsyncadd (%p2055_p12), %s1725_s26, 4294966784  ;;  %p19_p13 = scmp.ge.s32.totalorder %s2413_s11, 4   ;;  %s2929_s27 = smov %s2324_s28 }
 0x775   : > { %s2930_s28 = smov %s2328_s29  ;;  %s2931_s29 = smov %s2424_s14 }
 0x776   : > { %s2932_s30 = smov %s2413_s11  ;;  %21 = sbr.rel (!%p19_p13) target bundleno = 4 (0x4), region = 98 }
 0x77b   :  { %1730 = vsyncpa [#allocation3], 1 }
 0x77c   :  { %1732 = vsyncpa [#allocation3 + $0x1], 1 }
 0x77d   :  { %1733 = vsyncpa [#allocation4], 1 }
 0x77e   :  { %1735 = vsyncpa [#allocation4 + $0x1], 1 }

</bundles_post_ra>
